<compile_context>
chip_gen: v7x
topology: tpu7x:2x2x1
jax: 0.10.0
libtpu: 0.0.40
codegen_flags: <defaults>
</compile_context>

<pallas_src>
import math
import functools

import jax
import jax.numpy as jnp
from jax.experimental import pallas as pl
from jax.experimental.pallas import tpu as pltpu


# ----------------------------------------------------------------------------
# Tiled linear kernel:  out = x @ w_t     (w_t already (K, N))
# ----------------------------------------------------------------------------
def _matmul_kernel(x_ref, w_ref, o_ref, acc_ref):
    @pl.when(pl.program_id(2) == 0)
    def _():
        acc_ref[...] = jnp.zeros_like(acc_ref)

    acc_ref[...] += jnp.dot(
        x_ref[...], w_ref[...], preferred_element_type=jnp.float32
    )

    @pl.when(pl.program_id(2) == pl.num_programs(2) - 1)
    def _():
        o_ref[...] = acc_ref[...].astype(o_ref.dtype)


def _fit_tile(dim_size, preferred):
    # Use the preferred tile when it evenly divides, otherwise fall back to the
    # full dimension (keeps the (8,128)-tiling constraint satisfied at small /
    # odd sizes; production sizes use the large aligned tiles).
    return preferred if dim_size % preferred == 0 else dim_size


def linear_pallas(x2d, w_t, *, out_dtype=None, tm=256, tn=256, tk=512):
    """x2d: (M, K), w_t: (K, N) pre-transposed weight.  Returns (M, N)."""
    M, K = x2d.shape
    K2, N = w_t.shape
    assert K == K2
    out_dtype = out_dtype or x2d.dtype
    tm, tn, tk = _fit_tile(M, tm), _fit_tile(N, tn), _fit_tile(K, tk)
    grid = (M // tm, N // tn, K // tk)
    return pl.pallas_call(
        _matmul_kernel,
        out_shape=jax.ShapeDtypeStruct((M, N), out_dtype),
        grid=grid,
        in_specs=[
            pl.BlockSpec((tm, tk), lambda i, j, k: (i, k)),
            pl.BlockSpec((tk, tn), lambda i, j, k: (k, j)),
        ],
        out_specs=pl.BlockSpec((tm, tn), lambda i, j, k: (i, j)),
        scratch_shapes=[pltpu.VMEM((tm, tn), jnp.float32)],
        compiler_params=pltpu.CompilerParams(
            dimension_semantics=("parallel", "parallel", "arbitrary")
        ),
    )(x2d, w_t)


# ----------------------------------------------------------------------------
# Flash-style attention kernel (online softmax, streamed KV blocks)
# ----------------------------------------------------------------------------
def _flash_attn_kernel(q_ref, k_ref, v_ref, mask_ref, o_ref,
                       m_sc, l_sc, acc_sc, *, scale):
    kb = pl.program_id(2)

    @pl.when(kb == 0)
    def _():
        m_sc[...] = jnp.full_like(m_sc, -jnp.inf)
        l_sc[...] = jnp.zeros_like(l_sc)
        acc_sc[...] = jnp.zeros_like(acc_sc)

    q = q_ref[0, 0]                                   # (slen, hd)  bf16
    k = k_ref[0, 0]                                   # (bk,   hd)  bf16
    v = v_ref[0, 0]                                   # (bk,   hd)  bf16
    m_add = mask_ref[...].astype(jnp.float32)         # (slen, bk)  additive mask

    # scores in f32 (bf16 MXU inputs, f32 accumulation)
    s = jax.lax.dot_general(
        q, k, (((1,), (1,)), ((), ())), preferred_element_type=jnp.float32
    )
    s = s * scale + m_add

    m_prev = m_sc[...]                                # (slen, 1)
    m_new = jnp.maximum(m_prev, jnp.max(s, axis=-1, keepdims=True))
    alpha = jnp.exp(m_prev - m_new)
    p = jnp.exp(s - m_new)                            # f32 softmax numerics

    l_sc[...] = alpha * l_sc[...] + jnp.sum(p, axis=-1, keepdims=True)
    acc_sc[...] = alpha * acc_sc[...] + jax.lax.dot_general(
        p.astype(v.dtype), v, (((1,), (0,)), ((), ())),
        preferred_element_type=jnp.float32,
    )
    m_sc[...] = m_new

    @pl.when(kb == pl.num_programs(2) - 1)
    def _():
        inv_l = pl.reciprocal(l_sc[...], approx=True)
        o_ref[0, 0] = (acc_sc[...] * inv_l).astype(o_ref.dtype)


def sdpa_pallas(q, k, v, mask2d, *, n_rep, block_k=512):
    """q: (bs, H, slen, hd)   k, v: (bs, H_kv, cache_len, hd)
    mask2d: (slen, cache_len) additive float mask.  Returns (bs, H, slen, hd)."""
    bs, n_heads, slen, hd = q.shape
    _, n_kv, cache_len, _ = k.shape
    assert n_heads == n_kv * n_rep
    bk = block_k if cache_len % block_k == 0 else cache_len
    num_kb = cache_len // bk
    scale = 1.0 / math.sqrt(hd)
    kernel = functools.partial(_flash_attn_kernel, scale=scale)

    return pl.pallas_call(
        kernel,
        out_shape=jax.ShapeDtypeStruct((bs, n_heads, slen, hd), q.dtype),
        grid=(bs, n_heads, num_kb),
        in_specs=[
            pl.BlockSpec((1, 1, slen, hd), lambda b, h, kb: (b, h, 0, 0)),
            # GQA via index_map: query head h reads kv head h // n_rep
            pl.BlockSpec((1, 1, bk, hd), lambda b, h, kb: (b, h // n_rep, kb, 0)),
            pl.BlockSpec((1, 1, bk, hd), lambda b, h, kb: (b, h // n_rep, kb, 0)),
            # single 2D mask, tiled along the KV axis only
            pl.BlockSpec((slen, bk), lambda b, h, kb: (0, kb)),
        ],
        out_specs=pl.BlockSpec((1, 1, slen, hd), lambda b, h, kb: (b, h, 0, 0)),
        scratch_shapes=[
            pltpu.VMEM((slen, 1), jnp.float32),   # m (running max)
            pltpu.VMEM((slen, 1), jnp.float32),   # l (running denom)
            pltpu.VMEM((slen, hd), jnp.float32),  # acc
        ],
        compiler_params=pltpu.CompilerParams(
            dimension_semantics=("parallel", "parallel", "arbitrary")
        ),
    )(q, k, v, mask2d)


# ----------------------------------------------------------------------------
# Rotary embedding (real cos/sin formulation — no complex64)
# ----------------------------------------------------------------------------
def precompute_rotary(head_dim, positions, theta=10000.0):
    freqs = 1.0 / (theta ** (jnp.arange(0, head_dim, 2, dtype=jnp.float32) / head_dim))
    angles = jnp.outer(positions.astype(jnp.float32), freqs)      # (slen, hd//2)
    return jnp.cos(angles), jnp.sin(angles)


def apply_rotary_emb(xq, xk, cos, sin):
    """xq: (bs, slen, Hq, hd), xk: (bs, slen, Hk, hd); cos/sin: (slen, hd//2)."""
    def rot(x):
        xf = x.astype(jnp.float32)
        x_even = xf[..., 0::2]
        x_odd = xf[..., 1::2]
        c = cos[None, :, None, :]
        s = sin[None, :, None, :]
        out = jnp.stack([x_even * c - x_odd * s, x_even * s + x_odd * c], axis=-1)
        return out.reshape(x.shape).astype(x.dtype)
    return rot(xq), rot(xk)


# ----------------------------------------------------------------------------
# Module
# ----------------------------------------------------------------------------
class AttentionPallas:
    def __init__(self, dim, n_heads, n_kv_heads, max_seq_len, key,
                 attn_block_k=512, param_dtype=jnp.bfloat16):
        self.dim = dim
        self.n_heads = n_heads
        self.n_kv_heads = n_kv_heads
        self.n_local_heads = n_heads            # model_parallel_size == 1
        self.n_local_kv_heads = n_kv_heads
        self.n_rep = self.n_local_heads // self.n_local_kv_heads
        self.head_dim = dim // n_heads
        self.max_seq_len = max_seq_len
        self.attn_block_k = attn_block_k

        k1, k2, k3, k4 = jax.random.split(key, 4)
        s = 0.02
        # Weights stored PRE-TRANSPOSED (in_features, out_features) in bf16 so
        # the forward pass never materializes w.T and feeds the MXU directly.
        self.wq_t = (s * jax.random.normal(k1, (dim, n_heads * self.head_dim),
                                           jnp.float32)).astype(param_dtype)
        self.wk_t = (s * jax.random.normal(k2, (dim, n_kv_heads * self.head_dim),
                                           jnp.float32)).astype(param_dtype)
        self.wv_t = (s * jax.random.normal(k3, (dim, n_kv_heads * self.head_dim),
                                           jnp.float32)).astype(param_dtype)
        self.wo_t = (s * jax.random.normal(k4, (n_heads * self.head_dim, dim),
                                           jnp.float32)).astype(param_dtype)

    def setup_cache(self, max_batch_size, dtype=jnp.bfloat16):
        # Head-major cache layout so the attention kernel reads it directly
        # (no full-cache transpose each forward).
        shape = (max_batch_size, self.n_local_kv_heads, self.max_seq_len, self.head_dim)
        self.key_cache = jnp.zeros(shape, dtype)
        self.value_cache = jnp.zeros(shape, dtype)

    def forward(self, x, mask, freqs_cis, position_ids):
        """x: (bs, slen, dim).  mask: additive float mask broadcastable to
        (slen, max_seq_len) (leading singleton dims allowed).
        freqs_cis: (cos, sin) tuple, each (slen, head_dim//2)."""
        bs, slen, dim = x.shape
        cos, sin = freqs_cis
        x2d = x.reshape(bs * slen, dim).astype(jnp.bfloat16)

        # QKV projections (tiled Pallas matmuls, bf16 MXU, f32 accumulation)
        xq = linear_pallas(x2d, self.wq_t, out_dtype=jnp.float32)
        xk = linear_pallas(x2d, self.wk_t, out_dtype=jnp.float32)
        xv = linear_pallas(x2d, self.wv_t, out_dtype=jnp.float32)
        xq = xq.reshape(bs, slen, self.n_local_heads, self.head_dim)
        xk = xk.reshape(bs, slen, self.n_local_kv_heads, self.head_dim)
        xv = xv.reshape(bs, slen, self.n_local_kv_heads, self.head_dim)

        # Rotary embedding (f32, real cos/sin)
        xq, xk = apply_rotary_emb(xq, xk, cos, sin)

        # KV-cache update (only the small new slice is permuted, never the cache)
        xk_hm = jnp.transpose(xk, (0, 2, 1, 3)).astype(self.key_cache.dtype)
        xv_hm = jnp.transpose(xv, (0, 2, 1, 3)).astype(self.value_cache.dtype)
        self.key_cache = self.key_cache.at[:bs, :, position_ids].set(xk_hm)
        self.value_cache = self.value_cache.at[:bs, :, position_ids].set(xv_hm)
        k_all = self.key_cache[:bs].astype(jnp.bfloat16)
        v_all = self.value_cache[:bs].astype(jnp.bfloat16)

        # Attention (flash-style Pallas kernel, GQA handled in the index_map)
        q = jnp.transpose(xq, (0, 2, 1, 3)).astype(jnp.bfloat16)   # (bs, H, slen, hd)
        # TODO(synk): per-batch / per-head masks would need their own BlockSpec
        # index_map; here the mask is a single broadcastable (slen, cache_len).
        mask2d = mask.reshape(mask.shape[-2], mask.shape[-1]).astype(jnp.float32)
        attn = sdpa_pallas(q, k_all, v_all, mask2d,
                           n_rep=self.n_rep, block_k=self.attn_block_k)

        # (bs, H, slen, hd) -> (bs*slen, H*hd); small activation, cheap permute
        attn2d = jnp.transpose(attn, (0, 2, 1, 3)).reshape(
            bs * slen, self.n_local_heads * self.head_dim)

        # Output projection
        out = linear_pallas(attn2d, self.wo_t, out_dtype=jnp.float32)
        out = out.reshape(bs, slen, self.dim)

        # reduce_from_tensor_model_parallel_region: identity for world size 1
        return out


# ----------------------------------------------------------------------------
# Pure-JAX reference (mirrors the kernel's bf16-input / f32-accumulate numerics)
# ----------------------------------------------------------------------------
def reference_forward(m: AttentionPallas, x, mask, cos, sin, position_ids):
    bs, slen, dim = x.shape
    x2 = x.reshape(-1, dim).astype(jnp.bfloat16)
    xq = jnp.dot(x2, m.wq_t, preferred_element_type=jnp.float32)
    xk = jnp.dot(x2, m.wk_t, preferred_element_type=jnp.float32)
    xv = jnp.dot(x2, m.wv_t, preferred_element_type=jnp.float32)
    xq = xq.reshape(bs, slen, m.n_local_heads, m.head_dim)
    xk = xk.reshape(bs, slen, m.n_local_kv_heads, m.head_dim)
    xv = xv.reshape(bs, slen, m.n_local_kv_heads, m.head_dim)
    xq, xk = apply_rotary_emb(xq, xk, cos, sin)

    # reference uses the original (bs, seq, kvh, hd) cache layout
    kc = jnp.zeros((bs, m.max_seq_len, m.n_local_kv_heads, m.head_dim), jnp.float32)
    vc = jnp.zeros_like(kc)
    kc = kc.at[:, position_ids].set(xk)
    vc = vc.at[:, position_ids].set(xv)

    xqf = jnp.transpose(xq, (0, 2, 1, 3))
    xkf = jnp.repeat(jnp.transpose(kc, (0, 2, 1, 3)), m.n_rep, axis=1)
    xvf = jnp.repeat(jnp.transpose(vc, (0, 2, 1, 3)), m.n_rep, axis=1)

    def bf16(a):
        return a.astype(jnp.bfloat16).astype(jnp.float32)

    scale = 1.0 / math.sqrt(m.head_dim)
    s = jnp.einsum("bhqd,bhkd->bhqk", bf16(xqf), bf16(xkf)) * scale + mask
    p = jax.nn.softmax(s, axis=-1)
    o = jnp.einsum("bhqk,bhkd->bhqd", bf16(p), bf16(xvf))
    o = jnp.transpose(o, (0, 2, 1, 3)).reshape(bs * slen, -1)
    out = jnp.dot(o.astype(jnp.bfloat16), m.wo_t, preferred_element_type=jnp.float32)
    return out.reshape(bs, slen, dim)


# ----------------------------------------------------------------------------
if __name__ == "__main__":
    # Small config: dim=32, n_heads=4, n_kv_heads=2, head_dim=8.
    # max_seq_len=256 with block_k=128 so the flash loop runs 2 KV blocks.
    dim, n_heads, n_kv_heads = 32, 4, 2
    max_seq_len = 256
    bs, slen = 2, 8

    key = jax.random.PRNGKey(0)
    kw, kx = jax.random.split(key)

    attn = AttentionPallas(dim, n_heads, n_kv_heads, max_seq_len, kw, attn_block_k=128)
    attn.setup_cache(bs, jnp.bfloat16)

    x = jax.random.normal(kx, (bs, slen, dim), jnp.float32)
    position_ids = jnp.arange(slen, dtype=jnp.int32)
    cos, sin = precompute_rotary(attn.head_dim, position_ids)

    # Additive causal mask over the cache (unwritten positions are masked too,
    # which the causal condition already guarantees).
    q_pos = position_ids[:, None]
    k_pos = jnp.arange(max_seq_len, dtype=jnp.int32)[None, :]
    mask = jnp.where(k_pos <= q_pos, 0.0, jnp.float32(-1e9)).astype(jnp.float32)

    out = attn.forward(x, mask, (cos, sin), position_ids)
    out = jax.block_until_ready(out)

    ref = reference_forward(attn, x, mask, cos, sin, position_ids)
    assert out.shape == (bs, slen, dim)
    max_err = float(jnp.max(jnp.abs(out - ref)))
    assert jnp.allclose(out, ref, rtol=2e-2, atol=2e-3), f"mismatch vs reference (max abs err {max_err})"

    print("KERNEL_OK")
</pallas_src>

<mosaic_0001>
module attributes {stable_mosaic.version = 11 : i64} {
  func.func @_matmul_kernel(%arg0: i32, %arg1: i32, %arg2: i32, %arg3: memref<16x32xbf16, #tpu.memory_space<vmem>>, %arg4: memref<32x32xbf16, #tpu.memory_space<vmem>>, %arg5: memref<16x32xf32, #tpu.memory_space<vmem>>, %arg6: memref<16x32xf32, #tpu.memory_space<vmem>>) attributes {dimension_semantics = [#tpu.dimension_semantics<parallel>, #tpu.dimension_semantics<parallel>, #tpu.dimension_semantics<arbitrary>], iteration_bounds = array<i64: 1, 1, 1>, scalar_prefetch = 0 : i64, scratch_operands = 1 : i64, tpu.core_type = #tpu.core_type<tc>, window_params = [{transform_indices = @transform_0, window_bounds = array<i64: 16, 32>}, {transform_indices = @transform_1, window_bounds = array<i64: 32, 32>}, {transform_indices = @transform_2, window_bounds = array<i64: 16, 32>}]} {
    %c0_i32 = arith.constant 0 : i32
    %0 = arith.cmpi eq, %arg2, %c0_i32 : i32
    %1 = arith.extui %0 : i1 to i32
    %c0_i32_0 = arith.constant 0 : i32
    %2 = arith.cmpi ne, %1, %c0_i32_0 : i32
    scf.if %2 {
      %cst_10 = arith.constant 0.000000e+00 : f32
      %12 = vector.broadcast %cst_10 : f32 to vector<16x32xf32>
      %c0_11 = arith.constant 0 : index
      %c0_12 = arith.constant 0 : index
      %13 = vector.load %arg6[%c0_11, %c0_12] : memref<16x32xf32, #tpu.memory_space<vmem>>, vector<16x32xf32>
      tpu.vector_store %arg6[%c0_11, %c0_12], %12 {strides = array<i32>} : memref<16x32xf32, #tpu.memory_space<vmem>>, vector<16x32xf32>,
    } else {
    }
    %c0 = arith.constant 0 : index
    %c0_1 = arith.constant 0 : index
    %3 = vector.load %arg6[%c0, %c0_1] : memref<16x32xf32, #tpu.memory_space<vmem>>, vector<16x32xf32>
    %c0_2 = arith.constant 0 : index
    %c0_3 = arith.constant 0 : index
    %4 = vector.load %arg3[%c0_2, %c0_3] : memref<16x32xbf16, #tpu.memory_space<vmem>>, vector<16x32xbf16>
    %c0_4 = arith.constant 0 : index
    %c0_5 = arith.constant 0 : index
    %5 = vector.load %arg4[%c0_4, %c0_5] : memref<32x32xbf16, #tpu.memory_space<vmem>>, vector<32x32xbf16>
    %cst = arith.constant dense<0.000000e+00> : vector<16x32xf32>
    %6 = tpu.matmul %4, %5, %cst {dimension_numbers = #tpu.dot_dimension_numbers<[1], [0], [0], [1], [0, 0, 1, 1], [], []>} : vector<16x32xbf16>, vector<32x32xbf16>, vector<16x32xf32> -> vector<16x32xf32>
    %7 = arith.addf %3, %6 : vector<16x32xf32>
    %c0_6 = arith.constant 0 : index
    %c0_7 = arith.constant 0 : index
    %8 = vector.load %arg6[%c0_6, %c0_7] : memref<16x32xf32, #tpu.memory_space<vmem>>, vector<16x32xf32>
    tpu.vector_store %arg6[%c0_6, %c0_7], %7 {strides = array<i32>} : memref<16x32xf32, #tpu.memory_space<vmem>>, vector<16x32xf32>,
    %c0_i32_8 = arith.constant 0 : i32
    %9 = arith.cmpi eq, %arg2, %c0_i32_8 : i32
    %10 = arith.extui %9 : i1 to i32
    %c0_i32_9 = arith.constant 0 : i32
    %11 = arith.cmpi ne, %10, %c0_i32_9 : i32
    scf.if %11 {
      %c0_10 = arith.constant 0 : index
      %c0_11 = arith.constant 0 : index
      %12 = vector.load %arg6[%c0_10, %c0_11] : memref<16x32xf32, #tpu.memory_space<vmem>>, vector<16x32xf32>
      %c0_12 = arith.constant 0 : index
      %c0_13 = arith.constant 0 : index
      %13 = vector.load %arg5[%c0_12, %c0_13] : memref<16x32xf32, #tpu.memory_space<vmem>>, vector<16x32xf32>
      tpu.vector_store %arg5[%c0_12, %c0_13], %12 {strides = array<i32>} : memref<16x32xf32, #tpu.memory_space<vmem>>, vector<16x32xf32>,
    } else {
    }
    return
  }
  func.func @transform_0(%arg0: i32, %arg1: i32, %arg2: i32) -> (i32, i32) {
    %c0_i32 = arith.constant 0 : i32
    return %arg0, %arg2 : i32, i32
  }
  func.func @transform_1(%arg0: i32, %arg1: i32, %arg2: i32) -> (i32, i32) {
    %c0_i32 = arith.constant 0 : i32
    return %arg2, %arg1 : i32, i32
  }
  func.func @transform_2(%arg0: i32, %arg1: i32, %arg2: i32) -> (i32, i32) {
    %c0_i32 = arith.constant 0 : i32
    return %arg0, %arg1 : i32, i32
  }
}

</mosaic_0001>

<bundles_post_ra>
// kernel: tpu_custom_call.1
= control target key start
LH: loop header
LB: loop body
LE: loop exit
PB: predicated region body
PF: predicated region fallthrough
CT: control target
= control target key end

     0   :  { %7 = vsyncpa [#allocation4], 0  ;;  %s313_s0 = inlined_call_operand.hbm [shape: bf16[16,32], index: 0, kind: input, shape index: {}]   ;;  %s314_s1 = inlined_call_operand.hbm [shape: bf16[32,32], index: 1, kind: input, shape index: {}]   ;;  %s315_s2 = inlined_call_operand.hbm [shape: f32[16,32], index: 2, kind: output, shape index: {}]  }
   0x1   :  { %8 = vsyncpa [#allocation7], 0 }
   0x2   :  { %9 = vsyncpa [#allocation5], 0  ;;  %s246_s9 = smov [#allocation3]   ;;  %s174_s13 = scalar_lea.hbm %s313_s0, 128 }
   0x3   :  { %s15_s10 = sshll.u32 %s246_s9, 4  ;;  %p175_p0 = scmp.ne.s32.totalorder %s313_s0, %s174_s13  ;;  %s16_s10 = int_to_ptr.vmem [resolvable:$true] %s15_s10 }
   0x4   :  { %p178_p1 = scmp.lt.u32.totalorder %s174_s13, %s313_s0 }
   0x6   :  { %p180_p2 = pnand %p178_p1, %p175_p0 }
   0x8   :  { %183 = shalt.err (!%p180_p2)
}
   0x9   :  { %s184_s18 = scalar_lea.vmem %s16_s10, 128  ;;  %p189_p4 = scmp.lt.s32.totalorder %s16_s10, %s16_s10 }
   0xa   :  { %p185_p3 = scmp.ne.s32.totalorder %s16_s10, %s184_s18  ;;  %p190_p5 = scmp.lt.s32.totalorder %s184_s18, %s184_s18 }
   0xc   :  { %p191_p6 = por %p190_p5, %p189_p4 }
   0xe   :  { %p192_p7 = pnand %p191_p6, %p185_p3 }
  0x10   :  { %195 = shalt.err (!%p192_p7)
}
  0x11   :  { %s247_s19 = smov 64   ;;  %s248_s20 = smov 4  }
  0x12   :  { %21 = dma.hbm_to_vmem [thread:$0]  %s313_s0, 128, %s16_s10, [#allocation4], %s247_s19, %s247_s19, %s248_s20  }
  0x13   :  { %s249_s23 = smov [#allocation6]   ;;  %s196_s27 = scalar_lea.hbm %s314_s1, 256 }
  0x14   :  { %s27_s24 = sshll.u32 %s249_s23, 4  ;;  %p197_p8 = scmp.ne.s32.totalorder %s314_s1, %s196_s27  ;;  %s28_s24 = int_to_ptr.vmem [resolvable:$true] %s27_s24 }
  0x15   :  { %p200_p9 = scmp.lt.u32.totalorder %s196_s27, %s314_s1 }
  0x17   :  { %p202_p10 = pnand %p200_p9, %p197_p8 }
  0x19   :  { %205 = shalt.err (!%p202_p10)
}
  0x1a   :  { %s206_s4 = scalar_lea.vmem %s28_s24, 256  ;;  %p211_p12 = scmp.lt.s32.totalorder %s28_s24, %s28_s24 }
  0x1b   :  { %p207_p11 = scmp.ne.s32.totalorder %s28_s24, %s206_s4  ;;  %p212_p13 = scmp.lt.s32.totalorder %s206_s4, %s206_s4 }
  0x1d   :  { %p213_p0 = por %p212_p13, %p211_p12 }
  0x1f   :  { %p214_p1 = pnand %p213_p0, %p207_p11 }
  0x21   :  { %217 = shalt.err (!%p214_p1)
}
  0x22   :  { %33 = dma.hbm_to_vmem [thread:$0]  %s314_s1, 256, %s28_s24, [#allocation7], %s247_s19, %s247_s19, %s248_s20  }
  0x23   :  { %240 = dma.done.wait [#allocation4], 128  }
  0x24   :  { %241 = vsyncadd [#allocation4], 4294967168 }
  0x25   :  { %242 = dma.done.wait [#allocation7], 256  }
  0x26   :  { %243 = vsyncadd [#allocation7], 4294967040  ;;  %vm45_vm0 = vcmask 261120   ;;  %v250_v0 = vmov 0.0   ;;  %vm251_vm1 = vmmov 0   ;;  %v171_v1 = vld [vmem:[#allocation6] sm:$0xff]  }
  0x27   :  { %154 = vmatprep.subr.bf16.mxu0 %v250_v0  ;;  %158 = vmatprep.mubr.msk.bf16.mxu0 %vm251_vm1, %v250_v0  ;;  %46 = vst.msk [vmem:[#allocation2] sm:$0xff] %vm45_vm0, %v250_v0  ;;  %47 = vst.msk [vmem:[#allocation2 + $0x8] sm:$0xff] %vm45_vm0, %v250_v0  ;;  %v172_v2 = vld [vmem:[#allocation6 + $0x8] sm:$0xff]   ;;  %v173_v3 = vld [vmem:[#allocation3] sm:$0xff]   ;;  %s252_s1 = smov [#allocation8]  }
  0x28   :  { %155 = vmatpush3.bf16.msra.mxu0 %v171_v1  ;;  %s134_s6 = sshll.u32 %s252_s1, 4  ;;  %s135_s6 = int_to_ptr.vmem [resolvable:$true] %s134_s6 }
  0x29   :  { %156 = vmatprep.subr.bf16.mxu0 %v250_v0  ;;  %s218_s7 = scalar_lea.vmem %s135_s6, 256  ;;  %p223_p3 = scmp.lt.s32.totalorder %s135_s6, %s135_s6 }
  0x2a   :  { %p219_p2 = scmp.ne.s32.totalorder %s135_s6, %s218_s7  ;;  %p224_p4 = scmp.lt.s32.totalorder %s218_s7, %s218_s7 }
  0x2c   :  { %157 = vmatpush3.bf16.msra.mxu0 %v172_v2  ;;  %p225_p5 = por %p224_p4, %p223_p3 }
  0x2e   :  { %v48_v4 = vld [vmem:[#allocation2] sm:$0xff]  ;;  %v49_v6 = vld [vmem:[#allocation2 + $0x8] sm:$0xff]  ;;  %p226_p6 = pnand %p225_p5, %p219_p2 }
  0x2f   :  { %159 = vmatmul.mubr.msk.bf16.vlgmr.msra.gmra.mrb[0].mxu0 %vm45_vm0, %v173_v3 }
 0x102   :  { %v111_v5 = vpop.f32.mrb[0].mxu0 }
 0x103   :  { %v118_v7 = vadd.f32 %v111_v5, %v48_v4  ;;  %v160_v8 = vpop.f32.mrb[1].mxu0 }
 0x104   :  { %v114_v9 = vpop.f32.mrb[2].mxu0 }
 0x105   :  { %120 = vst.msk [vmem:[#allocation2] sm:$0xff] %vm45_vm0, %v118_v7  ;;  %v119_v10 = vadd.f32 %v114_v9, %v49_v6  ;;  %v161_v11 = vpop.f32.mrb[3].mxu0 }
 0x107   :  { %121 = vst.msk [vmem:[#allocation2 + $0x8] sm:$0xff] %vm45_vm0, %v119_v10 }
 0x10c   :  { %v125_v12 = vld [vmem:[#allocation2] sm:$0xff] }
 0x10d   :  { %127 = vst.msk [vmem:[#allocation8] sm:$0xff] %vm45_vm0, %v125_v12 }
 0x10e   :  { %v126_v13 = vld [vmem:[#allocation2 + $0x8] sm:$0xff] }
 0x10f   :  { %128 = vst.msk [vmem:[#allocation8 + $0x8] sm:$0xff] %vm45_vm0, %v126_v13 }
 0x110   :  { %229 = shalt.err (!%p226_p6)
}
 0x111   :  { %s230_s10 = scalar_lea.hbm %s315_s2, 256 }
 0x112   :  { %p231_p7 = scmp.ne.s32.totalorder %s315_s2, %s230_s10  ;;  %p234_p8 = scmp.lt.u32.totalorder %s230_s10, %s315_s2 }
 0x114   :  { %p236_p9 = pnand %p234_p8, %p231_p7 }
 0x116   :  { %239 = shalt.err (!%p236_p9)
}
 0x117   :  { %s253_s15 = smov 128   ;;  %s254_s16 = smov 8  }
 0x118   :  { %140 = dma.vmem_to_hbm [thread:$0]  %s135_s6, 256, %s315_s2, [#allocation5], %s253_s15, %s253_s15, %s254_s16  }
 0x119   :  { %244 = dma.done.wait [#allocation5], 256  }
 0x11a   :  { %245 = vsyncadd [#allocation5], 4294967040 }
 0x11b   :  { %144 = vsyncpa [#allocation4], 1 }
 0x11c   :  { %145 = vsyncpa [#allocation7], 1 }
 0x11d   :  { %146 = vsyncpa [#allocation5], 1 }

</bundles_post_ra>
